<compile_context>
chip_gen: v5e
topology: v5e:2x2
jax: 0.10.0
libtpu: 0.0.40
codegen_flags: <defaults>
</compile_context>

<pallas_src>
import functools

import numpy as np
import jax
import jax.numpy as jnp
from jax.experimental import pallas as pl
from jax.experimental.pallas import tpu as pltpu


def _round_up(x, m):
    return ((x + m - 1) // m) * m


def _linear_embed_kernel(blk_field_ref, blk_start_ref,   # scalar-prefetch (SMEM)
                         x_ref, w_ref, bias_ref,          # inputs (VMEM)
                         o_ref,                           # output (VMEM)
                         acc_ref,                         # scratch (VMEM, f32)
                         *, use_mxu):
    v = pl.program_id(1)
    nv = pl.num_programs(1)

    @pl.when(v == 0)
    def _init():
        acc_ref[...] = jnp.zeros_like(acc_ref)

    tb, num_fields = x_ref.shape
    tv = w_ref.shape[0] if use_mxu else w_ref.shape[1]

    # Which field owns this vocab block, and the block's field-local starting row.
    f_id = blk_field_ref[v]
    local_start = blk_start_ref[v]

    # Select that field's index column with a tiny static select chain (F is small);
    # this replaces the old per-field full-vocab compares (F x less VPU work).
    xb = x_ref[...]
    xcol = xb[:, 0:1]
    for f in range(1, num_fields):
        xcol = jnp.where(f_id == f, xb[:, f:f + 1], xcol)

    # One-hot of the field-local indices against this block's TV lanes (single compare,
    # single cast per block -- no per-field astype in a loop).
    target = xcol - local_start                                   # (TB, 1) int32
    lane = jax.lax.broadcasted_iota(jnp.int32, (tb, tv), 1)       # (TB, TV)
    onehot = (lane == target).astype(jnp.float32)                 # (TB, TV)

    if use_mxu:
        # counts @ W on the MXU; padded W rows are zero so they contribute nothing.
        acc_ref[...] += jnp.dot(onehot, w_ref[...],
                                preferred_element_type=jnp.float32)
    else:
        # Tiny E (module default E=1): the MXU would use only E of its 128/256 output
        # columns, so use VPU multiply + XLU lane reduce instead.  w_ref is (E, TV).
        e_dim = w_ref.shape[0]
        w_rows = w_ref[...]
        cols = [jnp.sum(onehot * w_rows[e:e + 1, :], axis=-1, keepdims=True)
                for e in range(e_dim)]
        acc_ref[...] += cols[0] if e_dim == 1 else jnp.concatenate(cols, axis=-1)

    @pl.when(v == nv - 1)
    def _finalize():
        o_ref[...] = (acc_ref[...] + bias_ref[...]).astype(o_ref.dtype)


def init_linear_feature_embedding(in_features, weight, bias, *,
                                  vocab_tile=512, use_mxu=None):
    """One-time (init-time) packing of the embedding table -- NOT done per forward call.

    Each field's vocab slab is padded to a multiple of `vocab_tile` so W tiles never
    straddle a field boundary; per-block SMEM tables record the owning field and its
    field-local start row.  Returns a params dict consumed by linear_feature_embedding().
    """
    in_features = [int(v) for v in in_features]
    num_fields = len(in_features)
    weight = np.asarray(weight, np.float32)
    bias = np.asarray(bias, np.float32)
    total_vocab, out_features = weight.shape
    assert total_vocab == sum(in_features)
    if use_mxu is None:
        use_mxu = out_features >= 16      # tiny E wastes the MXU; see kernel comment

    tv = int(vocab_tile)
    nblk = [-(-vf // tv) for vf in in_features]          # vocab blocks per field
    num_vblocks = int(sum(nblk))
    padded_vocab = num_vblocks * tv

    blk_field = np.concatenate([np.full(n, f, np.int32) for f, n in enumerate(nblk)])
    blk_start = np.concatenate([np.arange(n, dtype=np.int32) * tv for n in nblk])

    orig_off = np.concatenate(([0], np.cumsum(in_features)[:-1])).astype(np.int64)
    pad_off = np.concatenate(([0], np.cumsum(np.array(nblk) * tv)[:-1])).astype(np.int64)

    w_packed = np.zeros((padded_vocab, out_features), np.float32)
    for f, vf in enumerate(in_features):
        w_packed[pad_off[f]:pad_off[f] + vf] = weight[orig_off[f]:orig_off[f] + vf]
    if not use_mxu:
        # (E, Vp): vocab on the lane axis so the E=1 path broadcasts without transposes.
        w_packed = np.ascontiguousarray(w_packed.T)

    return dict(
        w=jnp.asarray(w_packed),
        bias=jnp.asarray(bias.reshape(1, out_features)),
        blk_field=jnp.asarray(blk_field),
        blk_start=jnp.asarray(blk_start),
        num_fields=num_fields,
        out_features=int(out_features),
        vocab_tile=tv,
        num_vblocks=num_vblocks,
        use_mxu=bool(use_mxu),
    )


def linear_feature_embedding(params, x):
    """x: (B, F) int categorical indices (per-field local values, as in the PyTorch module)."""
    use_mxu = params["use_mxu"]
    tv = params["vocab_tile"]
    e = params["out_features"]
    num_fields = params["num_fields"]
    num_vblocks = params["num_vblocks"]

    batch, f_dim = x.shape
    assert f_dim == num_fields

    # Batch tiling: sublane-aligned (mult of 8); fill the MXU M dim (128) when B allows.
    b_pad = _round_up(batch, 8)
    tb = min(128, b_pad)
    b_pad = _round_up(b_pad, tb)
    x = x.astype(jnp.int32)
    if b_pad != batch:
        x = jnp.pad(x, ((0, b_pad - batch), (0, 0)))     # index 0 is valid for every field

    grid = (b_pad // tb, num_vblocks)

    if use_mxu:
        w_spec = pl.BlockSpec((tv, e), lambda b, v, bf, bs: (v, 0))
    else:
        w_spec = pl.BlockSpec((e, tv), lambda b, v, bf, bs: (0, v))

    kernel = functools.partial(_linear_embed_kernel, use_mxu=use_mxu)

    out = pl.pallas_call(
        kernel,
        out_shape=jax.ShapeDtypeStruct((b_pad, e), jnp.float32),
        grid_spec=pltpu.PrefetchScalarGridSpec(
            num_scalar_prefetch=2,            # blk_field, blk_start -> SMEM
            grid=grid,
            in_specs=[
                pl.BlockSpec((tb, num_fields), lambda b, v, bf, bs: (b, 0)),
                w_spec,                        # streamed table; double-buffered by default
                pl.BlockSpec((1, e), lambda b, v, bf, bs: (0, 0)),
            ],
            out_specs=pl.BlockSpec((tb, e), lambda b, v, bf, bs: (b, 0)),
            scratch_shapes=[pltpu.VMEM((tb, e), jnp.float32)],
        ),
        compiler_params=pltpu.CompilerParams(
            dimension_semantics=("parallel", "arbitrary"),
        ),
    )(params["blk_field"], params["blk_start"], x, params["w"], params["bias"])
    return out[:batch]


if __name__ == "__main__":
    def reference(x, weight, bias, in_features):
        offsets = jnp.asarray(
            np.concatenate(([0], np.cumsum(in_features)[:-1])), jnp.int32)
        idx = x + offsets[None, :]
        return weight[idx].sum(axis=1) + bias[None, :]

    # --- Test 1: module defaults (out_features=1 -> VPU/XLU path, MXU skipped) -------
    in_features = [10, 20, 15, 5]
    out_features = 1
    batch = 8
    key = jax.random.PRNGKey(0)
    k_w, k_x = jax.random.split(key)
    weight = jax.random.normal(k_w, (sum(in_features), out_features), jnp.float32)
    bias = jnp.zeros((out_features,), jnp.float32)
    cols = []
    for n in in_features:
        k_x, k_f = jax.random.split(k_x)
        cols.append(jax.random.randint(k_f, (batch, 1), 0, n, dtype=jnp.int32))
    x = jnp.concatenate(cols, axis=1)

    params = init_linear_feature_embedding(in_features, weight, bias)
    out = jax.block_until_ready(linear_feature_embedding(params, x))
    ref = reference(x, weight, bias, in_features)
    assert out.shape == (batch, out_features)
    assert np.allclose(np.asarray(out), np.asarray(ref), atol=1e-5, rtol=1e-5), \
        "E=1 (VPU) path mismatch"

    # --- Test 2: wider E + multi-block field + batch tiling (MXU path) ---------------
    in_features2 = [10, 600, 15, 5]      # the 600-entry field spans two 512-row vocab blocks
    out_features2 = 16
    batch2 = 130                         # pads to 256 -> two "parallel" batch tiles
    k_w2, k_x2 = jax.random.split(jax.random.PRNGKey(1))
    weight2 = jax.random.normal(k_w2, (sum(in_features2), out_features2), jnp.float32)
    bias2 = 0.1 * jax.random.normal(jax.random.PRNGKey(2), (out_features2,), jnp.float32)
    cols2 = []
    for n in in_features2:
        k_x2, k_f = jax.random.split(k_x2)
        cols2.append(jax.random.randint(k_f, (batch2, 1), 0, n, dtype=jnp.int32))
    x2 = jnp.concatenate(cols2, axis=1)

    params2 = init_linear_feature_embedding(in_features2, weight2, bias2)
    out2 = jax.block_until_ready(linear_feature_embedding(params2, x2))
    ref2 = reference(x2, weight2, bias2, in_features2)
    assert out2.shape == (batch2, out_features2)
    # MXU f32 matmuls may round internally through bf16 passes; the one-hot LHS keeps the
    # error bounded by table rounding, so use a looser tolerance for this path.
    assert np.allclose(np.asarray(out2), np.asarray(ref2), atol=3e-2, rtol=2e-2), \
        "MXU path mismatch"

    print("KERNEL_OK")
</pallas_src>

<mosaic_0001>
module attributes {stable_mosaic.version = 11 : i64} {
  func.func @_linear_embed_kernel(%arg0: i32, %arg1: i32, %arg2: memref<4xi32, #tpu.memory_space<smem>>, %arg3: memref<4xi32, #tpu.memory_space<smem>>, %arg4: memref<8x4xi32, #tpu.memory_space<vmem>>, %arg5: memref<1x512xf32, #tpu.memory_space<vmem>>, %arg6: memref<1x1xf32, #tpu.memory_space<vmem>>, %arg7: memref<8x1xf32, #tpu.memory_space<vmem>>, %arg8: memref<8x1xf32, #tpu.memory_space<vmem>>) attributes {dimension_semantics = [#tpu.dimension_semantics<parallel>, #tpu.dimension_semantics<arbitrary>], iteration_bounds = array<i64: 1, 4>, scalar_prefetch = 2 : i64, scratch_operands = 1 : i64, tpu.core_type = #tpu.core_type<tc>, window_params = [{transform_indices = @transform_0, window_bounds = array<i64: 8, 4>}, {transform_indices = @transform_1, window_bounds = array<i64: 1, 512>}, {pipeline_mode = #tpu.pipeline_mode<synchronous>, transform_indices = @transform_2, window_bounds = array<i64: 1, 1>}, {transform_indices = @transform_3, window_bounds = array<i64: 8, 1>}]} {
    %c0_i32 = arith.constant 0 : i32
    %0 = arith.cmpi eq, %arg1, %c0_i32 : i32
    %1 = arith.extui %0 : i1 to i32
    %c0_i32_0 = arith.constant 0 : i32
    %2 = arith.cmpi ne, %1, %c0_i32_0 : i32
    scf.if %2 {
      %cst_10 = arith.constant 0.000000e+00 : f32
      %36 = vector.broadcast %cst_10 : f32 to vector<8x1xf32>
      %c0_11 = arith.constant 0 : index
      %c0_12 = arith.constant 0 : index
      %37 = vector.load %arg8[%c0_11, %c0_12] : memref<8x1xf32, #tpu.memory_space<vmem>>, vector<8x1xf32>
      tpu.vector_store %arg8[%c0_11, %c0_12], %36 {strides = array<i32>} : memref<8x1xf32, #tpu.memory_space<vmem>>, vector<8x1xf32>,
    } else {
    }
    %3 = arith.index_cast %arg1 : i32 to index
    %4 = memref.load %arg2[%3] : memref<4xi32, #tpu.memory_space<smem>>
    %5 = arith.index_cast %arg1 : i32 to index
    %6 = memref.load %arg3[%5] : memref<4xi32, #tpu.memory_space<smem>>
    %c0 = arith.constant 0 : index
    %c0_1 = arith.constant 0 : index
    %7 = vector.load %arg4[%c0, %c0_1] : memref<8x4xi32, #tpu.memory_space<vmem>>, vector<8x4xi32>
    %8 = vector.extract_strided_slice %7 {offsets = [0, 0], sizes = [8, 1], strides = [1, 1]} : vector<8x4xi32> to vector<8x1xi32>
    %c1_i32 = arith.constant 1 : i32
    %9 = arith.cmpi eq, %4, %c1_i32 : i32
    %10 = vector.extract_strided_slice %7 {offsets = [0, 1], sizes = [8, 1], strides = [1, 1]} : vector<8x4xi32> to vector<8x1xi32>
    %11 = arith.select %9, %10, %8 : vector<8x1xi32>
    %c2_i32 = arith.constant 2 : i32
    %12 = arith.cmpi eq, %4, %c2_i32 : i32
    %13 = vector.extract_strided_slice %7 {offsets = [0, 2], sizes = [8, 1], strides = [1, 1]} : vector<8x4xi32> to vector<8x1xi32>
    %14 = arith.select %12, %13, %11 : vector<8x1xi32>
    %c3_i32 = arith.constant 3 : i32
    %15 = arith.cmpi eq, %4, %c3_i32 : i32
    %16 = vector.extract_strided_slice %7 {offsets = [0, 3], sizes = [8, 1], strides = [1, 1]} : vector<8x4xi32> to vector<8x1xi32>
    %17 = arith.select %15, %16, %14 : vector<8x1xi32>
    %18 = vector.broadcast %6 : i32 to vector<8x1xi32>
    %19 = arith.subi %17, %18 : vector<8x1xi32>
    %20 = tpu.iota {dimensions = array<i32: 1>} : vector<8x512xi32>
    %21 = vector.broadcast %19 : vector<8x1xi32> to vector<8x512xi32>
    %22 = arith.cmpi eq, %20, %21 : vector<8x512xi32>
    %23 = arith.extui %22 : vector<8x512xi1> to vector<8x512xi32>
    %24 = arith.sitofp %23 : vector<8x512xi32> to vector<8x512xf32>
    %c0_2 = arith.constant 0 : index
    %c0_3 = arith.constant 0 : index
    %25 = vector.load %arg5[%c0_2, %c0_3] : memref<1x512xf32, #tpu.memory_space<vmem>>, vector<1x512xf32>
    %26 = vector.broadcast %25 : vector<1x512xf32> to vector<8x512xf32>
    %27 = arith.mulf %24, %26 : vector<8x512xf32>
    %cst = arith.constant dense<0.000000e+00> : vector<8xf32>
    %28 = vector.multi_reduction <add>, %27, %cst [1] : vector<8x512xf32> to vector<8xf32>
    %29 = vector.shape_cast %28 : vector<8xf32> to vector<8x1xf32>
    %c0_4 = arith.constant 0 : index
    %c0_5 = arith.constant 0 : index
    %30 = vector.load %arg8[%c0_4, %c0_5] : memref<8x1xf32, #tpu.memory_space<vmem>>, vector<8x1xf32>
    %31 = arith.addf %30, %29 : vector<8x1xf32>
    %c0_6 = arith.constant 0 : index
    %c0_7 = arith.constant 0 : index
    %32 = vector.load %arg8[%c0_6, %c0_7] : memref<8x1xf32, #tpu.memory_space<vmem>>, vector<8x1xf32>
    tpu.vector_store %arg8[%c0_6, %c0_7], %31 {strides = array<i32>} : memref<8x1xf32, #tpu.memory_space<vmem>>, vector<8x1xf32>,
    %c3_i32_8 = arith.constant 3 : i32
    %33 = arith.cmpi eq, %arg1, %c3_i32_8 : i32
    %34 = arith.extui %33 : i1 to i32
    %c0_i32_9 = arith.constant 0 : i32
    %35 = arith.cmpi ne, %34, %c0_i32_9 : i32
    scf.if %35 {
      %c0_10 = arith.constant 0 : index
      %c0_11 = arith.constant 0 : index
      %36 = vector.load %arg8[%c0_10, %c0_11] : memref<8x1xf32, #tpu.memory_space<vmem>>, vector<8x1xf32>
      %c0_12 = arith.constant 0 : index
      %c0_13 = arith.constant 0 : index
      %37 = vector.load %arg6[%c0_12, %c0_13] : memref<1x1xf32, #tpu.memory_space<vmem>>, vector<1x1xf32>
      %38 = vector.broadcast %37 : vector<1x1xf32> to vector<8x1xf32>
      %39 = arith.addf %36, %38 : vector<8x1xf32>
      %c0_14 = arith.constant 0 : index
      %c0_15 = arith.constant 0 : index
      %40 = vector.load %arg7[%c0_14, %c0_15] : memref<8x1xf32, #tpu.memory_space<vmem>>, vector<8x1xf32>
      tpu.vector_store %arg7[%c0_14, %c0_15], %39 {strides = array<i32>} : memref<8x1xf32, #tpu.memory_space<vmem>>, vector<8x1xf32>,
    } else {
    }
    return
  }
  func.func @transform_0(%arg0: i32, %arg1: i32, %arg2: memref<4xi32, #tpu.memory_space<smem>>, %arg3: memref<4xi32, #tpu.memory_space<smem>>) -> (i32, i32) {
    %c0_i32 = arith.constant 0 : i32
    %c0_i32_0 = arith.constant 0 : i32
    return %arg0, %c0_i32 : i32, i32
  }
  func.func @transform_1(%arg0: i32, %arg1: i32, %arg2: memref<4xi32, #tpu.memory_space<smem>>, %arg3: memref<4xi32, #tpu.memory_space<smem>>) -> (i32, i32) {
    %c0_i32 = arith.constant 0 : i32
    %c0_i32_0 = arith.constant 0 : i32
    return %c0_i32, %arg1 : i32, i32
  }
  func.func @transform_2(%arg0: i32, %arg1: i32, %arg2: memref<4xi32, #tpu.memory_space<smem>>, %arg3: memref<4xi32, #tpu.memory_space<smem>>) -> (i32, i32) {
    %c0_i32 = arith.constant 0 : i32
    %c0_i32_0 = arith.constant 0 : i32
    %c0_i32_1 = arith.constant 0 : i32
    return %c0_i32, %c0_i32_0 : i32, i32
  }
  func.func @transform_3(%arg0: i32, %arg1: i32, %arg2: memref<4xi32, #tpu.memory_space<smem>>, %arg3: memref<4xi32, #tpu.memory_space<smem>>) -> (i32, i32) {
    %c0_i32 = arith.constant 0 : i32
    %c0_i32_0 = arith.constant 0 : i32
    return %arg0, %c0_i32 : i32, i32
  }
}

</mosaic_0001>

<bundles_post_ra>
// kernel: tpu_custom_call.1
= control target key start
LH: loop header
LB: loop body
LE: loop exit
PB: predicated region body
PF: predicated region fallthrough
CT: control target
= control target key end

     0   :  { %s469_s26 = smov [#allocation4]   ;;  %s470_s27 = smov [#allocation5]   ;;  %s565_s0 = inlined_call_operand.hbm [shape: s32[4], index: 0, kind: input, shape index: {}]   ;;  %s566_s2 = inlined_call_operand.vmem [shape: s32[8,4], index: 2, kind: input, shape index: {}]   ;;  %s567_s3 = inlined_call_operand.vmem [shape: f32[1,2048], index: 3, kind: input, shape index: {}]   ;;  %s568_s5 = inlined_call_operand.vmem [shape: f32[8,1], index: 5, kind: output, shape index: {}]   ;;  %s569_s1 = inlined_call_operand.hbm [shape: s32[4], index: 1, kind: input, shape index: {}]   ;;  %s570_s4 = inlined_call_operand.<no memory space> [shape: f32[1,1], index: 4, kind: input, shape index: {}]  }
   0x1   :  { %s11_s20 = sshll.u32 %s565_s0, 4  ;;  %s16_s23 = sshll.u32 %s569_s1, 4  ;;  %v20_v0 = vstv %s570_s4  ;;  %s12_s20 = int_to_ptr.hbm [resolvable:$true] %s11_s20  ;;  %s17_s23 = int_to_ptr.hbm [resolvable:$true] %s16_s23 }
   0x2   :  { %21 = vst [vmem:[#allocation6] sm:$0x1] %v20_v0  ;;  %14 = dma.hbm_to_smem %s12_s20, 16, %s469_s26, [#allocation3] }
   0x3   :  { %19 = dma.hbm_to_smem %s17_s23, 16, %s470_s27, [#allocation3] }
   0x4   :  { %455 = dma.done.wait [#allocation3], 32 }
   0x5   :  { %456 = vsyncadd [#allocation3], 4294967264 }
   0x6   :  { %24 = sfence }
   0x7   :  { %s514_s28 = smov 0   ;;  %s516_s0 = smov 0  }
   0x8   :  { %s518_s29 = smov 0  }
   0x9 LB: > { %s39_s1 = sadd.s32 1, %s463_s0  ;;  %p375_p0 = scmp.ge.s32.totalorder %s467_s29, 1  ;;  %s467_s29 = sphi %s518_s29, %s30_s29   ;;  %s463_s0 = sphi %s516_s0, %s572_s0   ;;  %s459_s28 = sphi %s514_s28, %s571_s28  }
   0xa   : > { %p40_p1 = scmp.ge.s32.totalorder %s39_s1, 4  ;;  %p175_p2 = scmp.lt.s32.totalorder %s467_s29, 5 }
   0xc   : > { %s574_s1 = smov (%p40_p1, %s39_s1), 0  ;;  %p176_p3 = pnand %p375_p0, %p175_p2 }
   0xd   : > { %s376_s4 = sshll.u32 (!%p176_p3), %s459_s28, 2  ;;  %p377_p5 = scmp.ne.s32.totalorder (!%p176_p3), %s459_s28, 0 }
   0xe   : > { %179 = sbr.rel (%p176_p3) target bundleno = 631 (0x277), region = 32  ;;  %p206_p4 = scmp.lt.s32.totalorder (!%p176_p3), %s376_s4, 15 }
  0x13   : > { %s576_s4 = smov (!%p206_p4, %s376_s4), 15  ;;  %217 = sbr.rel (%p377_p5) target bundleno = 26 (0x1a), region = 36 }
  0x14   : > { %s208_s7 = scalar_lea.vmem %s567_s3, %s576_s4 }
  0x18   : > { %vm218_vm0 = vcmask 7168   ;;  %v471_v1 = vmov 0.0  }
  0x19   : > { %219 = vst.msk [vmem:[#allocation2] sm:$0xff] %vm218_vm0, %v471_v1 }
  0x1a PF: > { %v222_v2 = vld [vmem:[%s566_s2] sm:$0xff]  ;;  %s472_s10 = smov 1   ;;  %s220_s11 = sld [smem:[#allocation4 + %s459_s28]]  ;;  %v473_v9 = vmov 3   ;;  %v246_v15 = vlaneseq  ;;  %v474_v25 = vmov 0.0   ;;  %vm287_vm8 = vcmask 7168  }
  0x1b   : > { %227 = vrot.lane.b32.xlu0 %v222_v2, %s472_s10  ;;  %416 = vset.pattern.permute.xlu1 %v473_v9  ;;  %s221_s14 = sld [smem:[#allocation5 + %s459_s28]]  ;;  %v266_v17 = vld [vmem:[%s208_s7] sm:$0xf]  ;;  %p382_p9 = scmp.ne.s32.totalorder %s459_s28, 3 }
  0x1c   : > { %417 = vset.pattern.permute.xlu0 %v473_v9  ;;  %v247_v16 = vand.u32 127, %v246_v15  ;;  %v268_v21 = vperm.slane %v266_v17, 0  ;;  %v269_v22 = vperm.slane %v266_v17, 1  ;;  %v270_v24 = vperm.slane %v266_v17, 2 }
  0x1d   : > { %v271_v31 = vperm.slane %v266_v17, 3 }
  0x1e   : > { %v248_v18 = vadd.s32 128, %v247_v16  ;;  %v249_v19 = vadd.s32 256, %v247_v16  ;;  %v250_v20 = vadd.s32 384, %v247_v16 }
  0x20   : > { %p223_p6 = scmp.eq.s32.totalorder %s220_s11, 1  ;;  %p230_p7 = scmp.eq.s32.totalorder %s220_s11, 2  ;;  %v285_v38 = vld [vmem:[#allocation2] sm:$0xff] }
  0x21   : > { %p237_p8 = scmp.eq.s32.totalorder %s220_s11, 3  ;;  %v244_v11 = vstv %s221_s14 }
  0x22   : > { %s224_s12 = scalar_select %p223_p6, 1, 0 }
  0x23   : > { %s231_s13 = scalar_select %p230_p7, 1, 0 }
  0x24   : > { %v225_v3 = vstv %s224_s12  ;;  %s238_s15 = scalar_select %p237_p8, 1, 0 }
  0x25   : > { %vm226_vm1 = vcmp.eq.s32.totalorder %v225_v3, 1  ;;  %v232_v6 = vstv %s231_s13 }
  0x26   : > { %vm233_vm2 = vcmp.eq.s32.totalorder %v232_v6, 1  ;;  %v239_v10 = vstv %s238_s15 }
  0x27   : > { %vm240_vm3 = vcmp.eq.s32.totalorder %v239_v10, 1 }
  0x8d   : > { %v228_v4 = vpop.permute.xlu0 %227 }
  0x8e   : > { %v229_v5 = vsel %vm226_vm1, %v222_v2, %v228_v4 }
  0x8f   : > { %234 = vrot.lane.b32.xlu0 %v229_v5, %s472_s10 }
 0x101   : > { %v235_v7 = vpop.permute.xlu0 %234 }
 0x102   : > { %v236_v8 = vsel %vm233_vm2, %v222_v2, %v235_v7 }
 0x103   : > { %241 = vrot.lane.b32.xlu1 %v236_v8, %s472_s10 }
 0x175   : > { %v242_v12 = vpop.permute.xlu1 %241 }
 0x176   : > { %v243_v13 = vsel %vm240_vm3, %v222_v2, %v242_v12 }
 0x177   : > { %v245_v14 = vsub.s32 %v243_v13, %v244_v11 }
 0x179   : > { %252 = vperm.xlu1 %416, %v245_v14  }
 0x1eb   : > { %v253_v23 = vpop.permute.xlu1 %252 }
 0x1ec   : > { %vm254_vm4 = vcmp.eq.s32.totalorder %v247_v16, %v253_v23  ;;  %vm255_vm5 = vcmp.eq.s32.totalorder %v248_v18, %v253_v23  ;;  %vm256_vm6 = vcmp.eq.s32.totalorder %v249_v19, %v253_v23  ;;  %vm257_vm7 = vcmp.eq.s32.totalorder %v250_v20, %v253_v23 }
 0x1ed   : > { %v378_v26 = vsel %vm254_vm4, 1.0, %v474_v25  ;;  %v379_v27 = vsel %vm255_vm5, 1.0, %v474_v25  ;;  %v380_v28 = vsel %vm256_vm6, 1.0, %v474_v25  ;;  %v381_v32 = vsel %vm257_vm7, 1.0, %v474_v25 }
 0x1ee   : > { %v276_v29 = vmul.f32 %v378_v26, %v268_v21  ;;  %v277_v30 = vmul.f32 %v379_v27, %v269_v22  ;;  %v278_v33 = vmul.f32 %v380_v28, %v270_v24  ;;  %v279_v35 = vmul.f32 %v381_v32, %v271_v31 }
 0x1f0   : > { %v280_v34 = vadd.f32 %v277_v30, %v276_v29 }
 0x1f2   : > { %v281_v36 = vadd.f32 %v280_v34, %v278_v33 }
 0x1f4   : > { %v282_v37 = vadd.f32 %v281_v36, %v279_v35 }
 0x1f6   : > { %283 = vadd.xlane.f32.xlu2 %v282_v37 }
 0x268   : > { %292 = sbr.rel (%p382_p9) target bundleno = 631 (0x277), region = 40 }
 0x269   : > { %v284_v39 = vpop.xlane.xlu2 %283 }
 0x26a   : > { %v286_v40 = vadd.f32 %v285_v38, %v284_v39 }
 0x26c   : > { %288 = vst.msk [vmem:[#allocation2] sm:$0xff] %vm287_vm8, %v286_v40 }
 0x26d   : > { %v418_v42 = vld [vmem:[#allocation6] ss:$0 sm:$0xff] }
 0x273   : > { %v293_v41 = vld [vmem:[#allocation2] sm:$0xff] }
 0x274   : > { %v298_v43 = vadd.f32 %v418_v42, %v293_v41 }
 0x276   : > { %299 = vst.msk [vmem:[%s568_s5] sm:$0xff] %vm287_vm8, %v298_v43 }
 0x277 PF: > { %s30_s29 = sadd.s32 1, %s467_s29   ;;  %s571_s28 = smov %s463_s0 }
 0x278   : > { %p27_p10 = scmp.ge.s32.totalorder %s30_s29, 6   ;;  %s572_s0 = smov %s574_s1 }
 0x27a   :  { %29 = sbr.rel (!%p27_p10) target bundleno = 9 (0x9), region = 73 }

</bundles_post_ra>
